<compile_context>
chip_gen: v6e
topology: v6e:2x2x1
jax: 0.10.0
libtpu: 0.0.40
codegen_flags: <defaults>
</compile_context>

<pallas_src>
import functools
import math

import jax
import jax.numpy as jnp
from jax import lax
from jax.experimental import pallas as pl
from jax.experimental.pallas import tpu as pltpu

_LANES = 128
_SUB_ROWS = 512            # inner slab: 512x128 f32 temporaries = 256 KiB each
_MAX_BLOCK_ROWS = 4096     # streaming DMA block: 4096x128 f32 = 2 MiB
_EPS = 1e-11
_LOG_EPS = math.log(_EPS)  # ~ -25.328


def _num_tensorcores():
    """2 TensorCores per device on v7x-class chips; 1 on v5e/v6e."""
    # TODO(synk): switch to pltpu.get_tpu_info() once a cores-per-chip field is
    # guaranteed; device_kind is the robust proxy today.
    try:
        kind = jax.devices()[0].device_kind
    except Exception:
        return 1
    return 2 if "7" in kind else 1


def _bce_kernel(logits_ref, targets_ref, out_ref, acc_ref, *,
                blocks_per_core, n_blocks, block_rows, last_rows):
    c = pl.program_id(0)          # core / partial-sum index ("parallel")
    j = pl.program_id(1)          # row-block index within the core ("arbitrary")
    gb = c * blocks_per_core + j  # global row-block id (may overhang by one)

    @pl.when(j == 0)
    def _():
        acc_ref[...] = jnp.zeros_like(acc_ref)

    def slab(r0, rows):
        # rows is static (and a multiple of 8); r0 may be static or traced.
        if isinstance(r0, int) and r0 == 0 and rows == block_rows:
            x = logits_ref[...]
            t = targets_ref[...]
        else:
            x = logits_ref[pl.ds(r0, rows), :]
            t = targets_ref[pl.ds(r0, rows), :]
        x = x.astype(jnp.float32)
        t = t.astype(jnp.float32)
        # log-sigmoid identity: 2 EUP pushes (exp, log1p) per vreg.
        ls = jnp.minimum(x, 0.0) - jnp.log1p(jnp.exp(-jnp.abs(x)))
        lp = jnp.maximum(ls, _LOG_EPS)       # ~= log(sigmoid(x) + eps)
        ln = jnp.maximum(ls - x, _LOG_EPS)   # ~= log(1 - sigmoid(x) + eps)
        contrib = ln + t * (lp - ln)         # = (1-t)*ln + t*lp
        # (rows,128) -> (8,128): whole-vreg VALU adds only; the single
        # cross-lane (XLU) reduce is deferred to finalize.
        return contrib.reshape(rows // 8, 8, _LANES).sum(axis=0)

    def accumulate(rows):
        # `rows` is static: exactly the valid rows of this block are read, so
        # no garbage ever reaches the accumulator (no masks needed).  Inner
        # unrolled fori_loop bounds temporary live range to _SUB_ROWS rows.
        part = jnp.zeros((8, _LANES), jnp.float32)
        full = rows // _SUB_ROWS
        tail = rows % _SUB_ROWS
        if full > 0:
            def body(s, p):
                r0 = pl.multiple_of(s * _SUB_ROWS, _SUB_ROWS)
                return p + slab(r0, _SUB_ROWS)
            part = lax.fori_loop(0, full, body, part, unroll=True)
        if tail:
            part = part + slab(full * _SUB_ROWS, tail)
        acc_ref[...] += part

    if n_blocks > 1:
        # Steady-state blocks: full unmasked accumulate.
        @pl.when(gb < n_blocks - 1)
        def _():
            accumulate(block_rows)

    # Final global block (possibly ragged in rows): only its valid rows are read.
    @pl.when(gb == n_blocks - 1)
    def _():
        accumulate(last_rows)

    # gb >= n_blocks (clamped overhang iteration on the last core): no-op.

    @pl.when(j == blocks_per_core - 1)
    def _():
        out_ref[0, 0] = jnp.sum(acc_ref[...])   # one XLU reduce per core


def bce_loss_logits(logits, targets):
    """Pallas equivalent of BCE_Loss_logits.forward. Returns an f32 scalar."""
    total_n = int(logits.size)
    assert total_n > 0

    x = jnp.ravel(logits)     # free reshape for contiguous inputs
    t = jnp.ravel(targets)    # keep native (possibly narrow) dtype in HBM
    if t.dtype == jnp.bool_:
        t = t.astype(jnp.int8)

    # Aligned prefix: a multiple of 8x128 = 1024 elements -> n_rows % 8 == 0,
    # so every in-kernel slice has a whole number of (8,128) stripes.
    n_rows = (total_n // (8 * _LANES)) * 8
    n_main = n_rows * _LANES

    total = jnp.float32(0.0)

    if n_rows > 0:
        xm = (x if n_main == total_n else x[:n_main]).reshape(n_rows, _LANES)
        tm = (t if n_main == total_n else t[:n_main]).reshape(n_rows, _LANES)

        # Single block == full row extent (layout-rule exempt); multi-block uses
        # 4096-row blocks (multiple of 32, so int8 targets pack cleanly).
        block_rows = n_rows if n_rows <= _MAX_BLOCK_ROWS else _MAX_BLOCK_ROWS
        n_blocks = -(-n_rows // block_rows)
        last_rows = n_rows - (n_blocks - 1) * block_rows

        num_cores = _num_tensorcores() if n_blocks >= 2 else 1
        num_cores = min(num_cores, n_blocks)
        blocks_per_core = -(-n_blocks // num_cores)

        if num_cores * blocks_per_core == n_blocks:
            def in_index_map(c, j):
                return (c * blocks_per_core + j, 0)
        else:
            # Odd block count on 2 cores: clamp the one overhang block of the
            # last core onto the last real block (skipped inside the kernel).
            def in_index_map(c, j):
                return (jnp.minimum(c * blocks_per_core + j, n_blocks - 1), 0)

        kernel = functools.partial(
            _bce_kernel,
            blocks_per_core=blocks_per_core,
            n_blocks=n_blocks,
            block_rows=block_rows,
            last_rows=last_rows,
        )

        partials = pl.pallas_call(
            kernel,
            out_shape=jax.ShapeDtypeStruct((num_cores, 1), jnp.float32),
            grid_spec=pltpu.PrefetchScalarGridSpec(
                num_scalar_prefetch=0,
                grid=(num_cores, blocks_per_core),
                in_specs=[
                    pl.BlockSpec((block_rows, _LANES), in_index_map),
                    pl.BlockSpec((block_rows, _LANES), in_index_map),
                ],
                out_specs=pl.BlockSpec(
                    (1, 1), lambda c, j: (c, 0),
                    memory_space=pltpu.MemorySpace.SMEM,
                ),
                scratch_shapes=[pltpu.VMEM((8, _LANES), jnp.float32)],
            ),
            compiler_params=pltpu.CompilerParams(
                dimension_semantics=("parallel", "arbitrary"),
                vmem_limit_bytes=32 * 1024 * 1024,
            ),
        )(xm, tm)
        total = jnp.sum(partials)

    if n_main != total_n:
        # <1024-element ragged tail: tiny plain-JAX reduction, no pad HBM copy.
        xt = x[n_main:].astype(jnp.float32)
        tt = t[n_main:].astype(jnp.float32)
        p = jax.nn.sigmoid(xt)
        total = total + jnp.sum(tt * jnp.log(p + _EPS)
                                + (1.0 - tt) * jnp.log(1.0 - p + _EPS))

    return -total / jnp.float32(total_n)


def _reference(logits, targets):
    t = targets.astype(jnp.float32)
    p = jax.nn.sigmoid(logits.astype(jnp.float32))
    pos = t * jnp.log(p + _EPS)
    neg = (1.0 - t) * jnp.log(1.0 - p + _EPS)
    return -jnp.mean(pos + neg)


if __name__ == "__main__":
    key = jax.random.PRNGKey(0)
    k1, k2 = jax.random.split(key)
    # NCHW-shaped synthetic inputs, consistent with a segmentation-style head.
    logits = jax.random.normal(k1, (2, 4, 16, 16), dtype=jnp.float32)
    # Targets stay in a narrow dtype all the way into the kernel.
    targets = jax.random.bernoulli(k2, 0.5, (2, 4, 16, 16)).astype(jnp.int8)

    loss = jax.block_until_ready(bce_loss_logits(logits, targets))
    ref = jax.block_until_ready(_reference(logits, targets))

    assert jnp.allclose(loss, ref, rtol=1e-5, atol=1e-6), (loss, ref)
    print("KERNEL_OK")
</pallas_src>

<mosaic_0001>
module attributes {stable_mosaic.version = 11 : i64} {
  func.func @_bce_kernel(%arg0: i32, %arg1: i32, %arg2: memref<16x128xf32, #tpu.memory_space<vmem>>, %arg3: memref<16x128xi8, #tpu.memory_space<vmem>>, %arg4: memref<1x1xf32, #tpu.memory_space<smem>>, %arg5: memref<8x128xf32, #tpu.memory_space<vmem>>) attributes {dimension_semantics = [#tpu.dimension_semantics<parallel>, #tpu.dimension_semantics<arbitrary>], iteration_bounds = array<i64: 1, 1>, scalar_prefetch = 0 : i64, scratch_operands = 1 : i64, tpu.core_type = #tpu.core_type<tc>, window_params = [{transform_indices = @transform_0, window_bounds = array<i64: 16, 128>}, {transform_indices = @transform_1, window_bounds = array<i64: 16, 128>}, {transform_indices = @transform_2, window_bounds = array<i64: 1, 1>}]} {
    %c1_i32 = arith.constant 1 : i32
    %0 = arith.muli %arg0, %c1_i32 : i32
    %1 = arith.addi %0, %arg1 : i32
    %c0_i32 = arith.constant 0 : i32
    %2 = arith.cmpi eq, %arg1, %c0_i32 : i32
    %3 = arith.extui %2 : i1 to i32
    %c0_i32_0 = arith.constant 0 : i32
    %4 = arith.cmpi ne, %3, %c0_i32_0 : i32
    scf.if %4 {
      %cst = arith.constant 0.000000e+00 : f32
      %11 = vector.broadcast %cst : f32 to vector<8x128xf32>
      %c0 = arith.constant 0 : index
      %c0_5 = arith.constant 0 : index
      %12 = vector.load %arg5[%c0, %c0_5] : memref<8x128xf32, #tpu.memory_space<vmem>>, vector<8x128xf32>
      tpu.vector_store %arg5[%c0, %c0_5], %11 {strides = array<i32>} : memref<8x128xf32, #tpu.memory_space<vmem>>, vector<8x128xf32>,
    } else {
    }
    %c0_i32_1 = arith.constant 0 : i32
    %5 = arith.cmpi eq, %1, %c0_i32_1 : i32
    %6 = arith.extui %5 : i1 to i32
    %c0_i32_2 = arith.constant 0 : i32
    %7 = arith.cmpi ne, %6, %c0_i32_2 : i32
    scf.if %7 {
      %cst = arith.constant 0.000000e+00 : f32
      %11 = vector.broadcast %cst : f32 to vector<8x128xf32>
      %c0 = arith.constant 0 : index
      %c0_5 = arith.constant 0 : index
      %12 = vector.load %arg2[%c0, %c0_5] : memref<16x128xf32, #tpu.memory_space<vmem>>, vector<16x128xf32>
      %c0_6 = arith.constant 0 : index
      %c0_7 = arith.constant 0 : index
      %13 = vector.load %arg3[%c0_6, %c0_7] : memref<16x128xi8, #tpu.memory_space<vmem>>, vector<16x128xi8>
      %14 = arith.sitofp %13 : vector<16x128xi8> to vector<16x128xf32>
      %cst_8 = arith.constant 0.000000e+00 : f32
      %15 = vector.broadcast %cst_8 : f32 to vector<16x128xf32>
      %16 = arith.minimumf %12, %15 : vector<16x128xf32>
      %17 = math.absf %12 : vector<16x128xf32>
      %cst_9 = arith.constant 0.000000e+00 : f32
      %18 = vector.broadcast %cst_9 : f32 to vector<16x128xf32>
      %19 = arith.subf %18, %17 : vector<16x128xf32>
      %20 = math.exp %19 : vector<16x128xf32>
      %21 = math.log1p %20 : vector<16x128xf32>
      %22 = arith.subf %16, %21 : vector<16x128xf32>
      %cst_10 = arith.constant -25.3284359 : f32
      %23 = vector.broadcast %cst_10 : f32 to vector<16x128xf32>
      %24 = arith.maximumf %22, %23 : vector<16x128xf32>
      %25 = arith.subf %22, %12 : vector<16x128xf32>
      %cst_11 = arith.constant -25.3284359 : f32
      %26 = vector.broadcast %cst_11 : f32 to vector<16x128xf32>
      %27 = arith.maximumf %25, %26 : vector<16x128xf32>
      %28 = arith.subf %24, %27 : vector<16x128xf32>
      %29 = arith.mulf %14, %28 : vector<16x128xf32>
      %30 = arith.addf %27, %29 : vector<16x128xf32>
      %31 = vector.shape_cast %30 : vector<16x128xf32> to vector<2x8x128xf32>
      %cst_12 = arith.constant dense<0.000000e+00> : vector<8x128xf32>
      %32 = vector.multi_reduction <add>, %31, %cst_12 [0] : vector<2x8x128xf32> to vector<8x128xf32>
      %33 = arith.addf %11, %32 : vector<8x128xf32>
      %c0_13 = arith.constant 0 : index
      %c0_14 = arith.constant 0 : index
      %34 = vector.load %arg5[%c0_13, %c0_14] : memref<8x128xf32, #tpu.memory_space<vmem>>, vector<8x128xf32>
      %35 = arith.addf %34, %33 : vector<8x128xf32>
      %c0_15 = arith.constant 0 : index
      %c0_16 = arith.constant 0 : index
      %36 = vector.load %arg5[%c0_15, %c0_16] : memref<8x128xf32, #tpu.memory_space<vmem>>, vector<8x128xf32>
      tpu.vector_store %arg5[%c0_15, %c0_16], %35 {strides = array<i32>} : memref<8x128xf32, #tpu.memory_space<vmem>>, vector<8x128xf32>,
    } else {
    }
    %c0_i32_3 = arith.constant 0 : i32
    %8 = arith.cmpi eq, %arg1, %c0_i32_3 : i32
    %9 = arith.extui %8 : i1 to i32
    %c0_i32_4 = arith.constant 0 : i32
    %10 = arith.cmpi ne, %9, %c0_i32_4 : i32
    scf.if %10 {
      %c0 = arith.constant 0 : index
      %c0_5 = arith.constant 0 : index
      %11 = vector.load %arg5[%c0, %c0_5] : memref<8x128xf32, #tpu.memory_space<vmem>>, vector<8x128xf32>
      %12 = vector.shape_cast %11 : vector<8x128xf32> to vector<1x8x128xf32>
      %cst = arith.constant dense<0.000000e+00> : vector<1xf32>
      %13 = vector.multi_reduction <add>, %12, %cst [1, 2] : vector<1x8x128xf32> to vector<1xf32>
      %14 = vector.shape_cast %13 : vector<1xf32> to vector<1x1x1xf32>
      %15 = vector.extract %14[0, 0, 0] : f32 from vector<1x1x1xf32>
      %c0_6 = arith.constant 0 : index
      %c0_7 = arith.constant 0 : index
      %16 = memref.load %arg4[%c0_6, %c0_7] : memref<1x1xf32, #tpu.memory_space<smem>>
      memref.store %15, %arg4[%c0_6, %c0_7] : memref<1x1xf32, #tpu.memory_space<smem>>
    } else {
    }
    return
  }
  func.func @transform_0(%arg0: i32, %arg1: i32) -> (i32, i32) {
    %c1_i32 = arith.constant 1 : i32
    %0 = arith.muli %arg0, %c1_i32 : i32
    %1 = arith.addi %0, %arg1 : i32
    %c0_i32 = arith.constant 0 : i32
    %c0_i32_0 = arith.constant 0 : i32
    return %1, %c0_i32 : i32, i32
  }
  func.func @transform_1(%arg0: i32, %arg1: i32) -> (i32, i32) {
    %c1_i32 = arith.constant 1 : i32
    %0 = arith.muli %arg0, %c1_i32 : i32
    %1 = arith.addi %0, %arg1 : i32
    %c0_i32 = arith.constant 0 : i32
    %c0_i32_0 = arith.constant 0 : i32
    return %1, %c0_i32 : i32, i32
  }
  func.func @transform_2(%arg0: i32, %arg1: i32) -> (i32, i32) {
    %c0_i32 = arith.constant 0 : i32
    %c0_i32_0 = arith.constant 0 : i32
    return %arg0, %c0_i32 : i32, i32
  }
}

</mosaic_0001>

<bundles_post_ra>
// kernel: tpu_custom_call.1
= control target key start
LH: loop header
LB: loop body
LE: loop exit
PB: predicated region body
PF: predicated region fallthrough
CT: control target
= control target key end

     0   :  { %7 = vsyncpa [#allocation4], 0  ;;  %s253_s0 = inlined_call_operand.hbm [shape: f32[16,128], index: 0, kind: input, shape index: {}]   ;;  %s254_s1 = inlined_call_operand.hbm [shape: s8[16,128], index: 1, kind: input, shape index: {}]   ;;  %s255_s2 = inlined_call_operand.hbm [shape: f32[1,1], index: 2, kind: output, shape index: {}]  }
   0x1   :  { %8 = vsyncpa [#allocation7], 0 }
   0x2   :  { %9 = vsyncpa [#allocation5], 0  ;;  %s222_s9 = smov [#allocation3]  }
   0x3   :  { %s19_s10 = sshll.u32 %s222_s9, 4  ;;  %s20_s10 = int_to_ptr.vmem [resolvable:$true] %s19_s10 }
   0x4   :  { %s176_s11 = scalar_lea.vmem %s20_s10, 256  ;;  %p181_p1 = scmp.lt.s32.totalorder %s20_s10, %s20_s10 }
   0x5   :  { %p177_p0 = scmp.ne.s32.totalorder %s20_s10, %s176_s11  ;;  %p182_p2 = scmp.lt.s32.totalorder %s176_s11, %s176_s11 }
   0x7   :  { %p183_p3 = por %p182_p2, %p181_p1 }
   0x9   :  { %p184_p4 = pnand %p183_p3, %p177_p0 }
   0xb   :  { %187 = shalt.err (!%p184_p4)
}
   0xc   :  { %s223_s12 = smov 128   ;;  %s224_s13 = smov 8  }
   0xd   :  { %25 = dma.hbm_to_vmem [thread:$0]  %s253_s0, 256, %s20_s10, [#allocation4], %s223_s12, %s223_s12, %s224_s13  }
   0xe   :  { %s225_s16 = smov [#allocation6]  }
   0xf   :  { %s35_s17 = sshll.u32 %s225_s16, 4  ;;  %s36_s17 = int_to_ptr.vmem [resolvable:$true] %s35_s17 }
  0x10   :  { %s196_s18 = scalar_lea.vmem %s36_s17, 64  ;;  %p201_p6 = scmp.lt.s32.totalorder %s36_s17, %s36_s17 }
  0x11   :  { %p197_p5 = scmp.ne.s32.totalorder %s36_s17, %s196_s18  ;;  %p202_p7 = scmp.lt.s32.totalorder %s196_s18, %s196_s18 }
  0x13   :  { %p203_p8 = por %p202_p7, %p201_p6 }
  0x15   :  { %p204_p9 = pnand %p203_p8, %p197_p5 }
  0x17   :  { %207 = shalt.err (!%p204_p9)
}
  0x18   :  { %s226_s19 = smov 32   ;;  %s227_s20 = smov 2  }
  0x19   :  { %41 = dma.hbm_to_vmem [thread:$0]  %s254_s1, 64, %s36_s17, [#allocation7], %s226_s19, %s226_s19, %s227_s20  }
  0x1a   :  { %216 = dma.done.wait [#allocation4], 256  }
  0x1b   :  { %217 = vsyncadd [#allocation4], 4294967040 }
  0x1c   :  { %218 = dma.done.wait [#allocation7], 64  }
  0x1d   :  { %219 = vsyncadd [#allocation7], 4294967232  ;;  %v62_v0 = vld [vmem:[#allocation3] sm:$0xff]  ;;  %v63_v1 = vld [vmem:[#allocation3 + $0x8] sm:$0xff]  ;;  %s228_s1 = smov [#allocation8]  }
  0x1e   :  { %v72_v2 = vand.u32 2147483647, %v62_v0  ;;  %v73_v3 = vand.u32 2147483647, %v63_v1  ;;  %v148_v20 = vld [vmem:[#allocation6] sm:$0xf]  }
  0x1f   :  { %v70_v21 = vmin.f32 %v62_v0, 0.0  ;;  %v71_v24 = vmin.f32 %v63_v1, 0.0  ;;  %v149_v28 = vunpack.c.0.s8 %v148_v20  ;;  %v150_v31 = vunpack.c.1.s8 %v148_v20 }
  0x20   :  { %v74_v4 = vsub.f32 0.0, %v72_v2  ;;  %v75_v5 = vsub.f32 0.0, %v73_v3 }
  0x21   :  { %v68_v37 = vcvt.s32.f32 %v149_v28  ;;  %v69_v39 = vcvt.s32.f32 %v150_v31 }
  0x22   :  { %v76_v6 = vmul.f32 1.442695, %v74_v4  ;;  %v78_v7 = vmul.f32 1.442695, %v75_v5 }
  0x24   :  { %160 = vpow2.f32 %v76_v6 }
  0x25   :  { %162 = vpow2.f32 %v78_v7 }
  0x31   :  { %v161_v8 = vpop.eup %160 }
  0x32   :  { %v163_v9 = vpop.eup %162  ;;  %v80_v10 = vadd.f32 1.0, %v161_v8  ;;  %v83_v12 = vmul.f32 -0.5, %v161_v8  ;;  %v86_v15 = vand.u32 2147483647, %v161_v8 }
  0x33   :  { %v89_v11 = vadd.f32 1.0, %v163_v9  ;;  %v92_v13 = vmul.f32 -0.5, %v163_v9  ;;  %v95_v17 = vand.u32 2147483647, %v163_v9 }
  0x34   :  { %164 = vlog2.f32 %v80_v10  ;;  %v84_v14 = vadd.f32 1.0, %v83_v12  ;;  %vm87_vm0 = vcmp.lt.f32.partialorder %v86_v15, 0.0004427343 }
  0x35   :  { %166 = vlog2.f32 %v89_v11  ;;  %v93_v16 = vadd.f32 1.0, %v92_v13  ;;  %vm96_vm1 = vcmp.lt.f32.partialorder %v95_v17, 0.0004427343 }
  0x36   :  { %v85_v18 = vmul.f32 %v161_v8, %v84_v14 }
  0x37   :  { %v94_v22 = vmul.f32 %v163_v9, %v93_v16 }
  0x41   :  { %v165_v19 = vpop.eup %164 }
  0x42   :  { %v167_v23 = vpop.eup %166  ;;  %v82_v25 = vmul.f32 0.6931472, %v165_v19 }
  0x43   :  { %v91_v26 = vmul.f32 0.6931472, %v167_v23 }
  0x44   :  { %v88_v27 = vsel %vm87_vm0, %v85_v18, %v82_v25 }
  0x45   :  { %v97_v29 = vsel %vm96_vm1, %v94_v22, %v91_v26  ;;  %v98_v30 = vsub.f32 %v70_v21, %v88_v27 }
  0x46   :  { %v99_v32 = vsub.f32 %v71_v24, %v97_v29 }
  0x47   :  { %v100_v33 = vmax.f32 %v98_v30, -25.328436  ;;  %v102_v34 = vsub.f32 %v98_v30, %v62_v0 }
  0x48   :  { %v101_v35 = vmax.f32 %v99_v32, -25.328436  ;;  %v103_v36 = vsub.f32 %v99_v32, %v63_v1 }
  0x49   :  { %v104_v38 = vmax.f32 %v102_v34, -25.328436 }
  0x4a   :  { %v105_v40 = vmax.f32 %v103_v36, -25.328436 }
  0x4b   :  { %v106_v41 = vsub.f32 %v100_v33, %v104_v38 }
  0x4c   :  { %v107_v42 = vsub.f32 %v101_v35, %v105_v40 }
  0x4d   :  { %v108_v43 = vmul.f32 %v106_v41, %v68_v37 }
  0x4e   :  { %v109_v44 = vmul.f32 %v107_v42, %v69_v39 }
  0x4f   :  { %v110_v45 = vadd.f32 %v108_v43, %v104_v38 }
  0x50   :  { %v111_v46 = vadd.f32 %v109_v44, %v105_v40 }
  0x52   :  { %v112_v47 = vadd.f32 %v111_v46, %v110_v45 }
  0x54   :  { %121 = vadd.xlane.f32.xlu0 %v112_v47 }
  0xdd   :  { %v122_v48 = vpop.xlane.xlu0 %121 }
  0xde   :  { %v123_v49 = vrot.slane %v122_v48, 4 }
  0xe0   :  { %v124_v50 = vadd.f32 %v123_v49, %v122_v48 }
  0xe2   :  { %v125_v51 = vrot.slane %v124_v50, 2 }
  0xe4   :  { %v126_v52 = vadd.f32 %v125_v51, %v124_v50 }
  0xe6   :  { %v127_v53 = vrot.slane %v126_v52, 1 }
  0xe8   :  { %v128_v54 = vadd.f32 %v127_v53, %v126_v52 }
  0xea   :  { %151 = vpush %v128_v54 }
 0x11b   :  { %s152_s0 = spop %151 }
 0x11c   :  { %131 = sst [smem:[#allocation8]] %s152_s0 }
 0x11d   :  { %139 = dma.smem_to_hbm %s228_s1, 16, %s255_s2, [#allocation5]  }
 0x11e   :  { %220 = dma.done.wait [#allocation5], 16  }
 0x11f   :  { %221 = vsyncadd [#allocation5], 4294967280 }
 0x120   :  { %143 = sfence }
 0x121   :  { %144 = vsyncpa [#allocation4], 1 }
 0x122   :  { %145 = vsyncpa [#allocation7], 1 }
 0x123   :  { %146 = vsyncpa [#allocation5], 1 }

</bundles_post_ra>
